<compile_context>
chip_gen: v7x
topology: tpu7x:2x2x1
jax: 0.10.0
libtpu: 0.0.40
codegen_flags: <defaults>
</compile_context>

<pallas_src>
import functools

import jax
import jax.numpy as jnp
from jax.experimental import pallas as pl
from jax.experimental.pallas import tpu as pltpu


def _fuse_kernel(x_ref, y_ref, wc_ref, bc_ref, out_ref, *, d):
    """One row-tile of the fused gate computation.

    x_ref, y_ref : (TM, d)    float32
    wc_ref       : (4d, 2d)   float32   -- [proj^T | gate^T | zeros]
    bc_ref       : (1, 2d)    float32   -- [b_proj | b_gate | zeros]
    out_ref      : (TM, d)    float32
    """
    x = x_ref[...]
    y = y_ref[...]

    # Concatenated feature [x, y, x*y, x-y] -> (TM, 4d); 4d = 128 lanes.
    cat = jnp.concatenate([x, y, x * y, x - y], axis=-1)

    # Single fused MXU matmul covering both the proj and the gate linears.
    acts = (jnp.dot(cat, wc_ref[...], preferred_element_type=jnp.float32)
            + bc_ref[...])

    m = jnp.tanh(acts[:, :d])              # proj branch
    g = jax.nn.sigmoid(acts[:, d:d + 1])   # gate logit (single column)

    out_ref[...] = g * m + (1.0 - g) * x


def init_fuse_params(key, input_size, hidden_size):
    """PyTorch nn.Linear default init: U(-1/sqrt(fan_in), 1/sqrt(fan_in))."""
    k = 1.0 / jnp.sqrt(jnp.float32(input_size))
    keys = jax.random.split(key, 4)

    def u(kk, shape):
        return jax.random.uniform(kk, shape, jnp.float32, minval=-k, maxval=k)

    return {
        "w_proj": u(keys[0], (hidden_size, input_size)),  # (d, 4d)
        "b_proj": u(keys[1], (hidden_size,)),
        "w_gate": u(keys[2], (1, input_size)),            # (1, 4d)
        "b_gate": u(keys[3], (1,)),
    }


def fuse_forward(x, y_hat, params, *, tile_m=8):
    """x, y_hat: (B, T, d) float32 -> (B, T, d) float32.

    Requires hidden_size == d and input_size == 4*d (as in slQA usage).
    """
    B, T, d = x.shape
    four_d = params["w_proj"].shape[1]
    assert four_d == 4 * d, "Fuse expects input_size == 4 * feature_dim"
    assert params["w_proj"].shape[0] == d, "Fuse expects hidden_size == feature_dim"

    # Pack proj + gate into one (4d, 2d) weight so the kernel does ONE matmul.
    wc = jnp.zeros((four_d, 2 * d), jnp.float32)
    wc = wc.at[:, :d].set(params["w_proj"].T)
    wc = wc.at[:, d].set(params["w_gate"][0])
    bc = jnp.zeros((1, 2 * d), jnp.float32)
    bc = bc.at[0, :d].set(params["b_proj"])
    bc = bc.at[0, d].set(params["b_gate"][0])

    # Flatten (B, T) into a dense row dimension.
    M = B * T
    x2 = x.reshape(M, d).astype(jnp.float32)
    y2 = y_hat.reshape(M, d).astype(jnp.float32)

    # Pad rows to a multiple of the tile (full sublane groups of 8).
    Mp = ((M + tile_m - 1) // tile_m) * tile_m
    if Mp != M:
        pad = Mp - M
        x2 = jnp.pad(x2, ((0, pad), (0, 0)))
        y2 = jnp.pad(y2, ((0, pad), (0, 0)))

    grid = (Mp // tile_m,)
    kernel = functools.partial(_fuse_kernel, d=d)

    out = pl.pallas_call(
        kernel,
        out_shape=jax.ShapeDtypeStruct((Mp, d), jnp.float32),
        grid=grid,
        in_specs=[
            pl.BlockSpec((tile_m, d), lambda i: (i, 0)),          # x rows
            pl.BlockSpec((tile_m, d), lambda i: (i, 0)),          # y rows
            pl.BlockSpec((four_d, 2 * d), lambda i: (0, 0)),      # weights (resident)
            pl.BlockSpec((1, 2 * d), lambda i: (0, 0)),           # bias (resident)
        ],
        out_specs=pl.BlockSpec((tile_m, d), lambda i: (i, 0)),
        compiler_params=pltpu.CompilerParams(
            dimension_semantics=("parallel",)),
    )(x2, y2, wc, bc)

    return out[:M].reshape(B, T, d)


def fuse_reference(x, y_hat, params):
    """Pure-JAX reference matching the PyTorch module."""
    cat = jnp.concatenate([x, y_hat, x * y_hat, x - y_hat], axis=-1)
    m = jnp.tanh(cat @ params["w_proj"].T + params["b_proj"])
    g = jax.nn.sigmoid(cat @ params["w_gate"].T + params["b_gate"])
    return g * m + (1.0 - g) * x


if __name__ == "__main__":
    # Small shapes consistent with the module: batch=2, seq=8, feature=hidden=32,
    # so the Linear layers see input_size = 4*32 = 128.
    B, T, HIDDEN = 2, 8, 32
    INPUT_SIZE = 4 * HIDDEN

    key = jax.random.PRNGKey(0)
    k_x, k_y, k_p = jax.random.split(key, 3)

    x = jax.random.normal(k_x, (B, T, HIDDEN), dtype=jnp.float32)
    y_hat = jax.random.normal(k_y, (B, T, HIDDEN), dtype=jnp.float32)
    params = init_fuse_params(k_p, INPUT_SIZE, HIDDEN)

    out = fuse_forward(x, y_hat, params)
    out = jax.block_until_ready(out)

    assert out.shape == (B, T, HIDDEN), out.shape
    assert out.dtype == jnp.float32

    ref = fuse_reference(x, y_hat, params)
    assert jnp.allclose(out, ref, atol=1e-4, rtol=1e-4), (
        float(jnp.max(jnp.abs(out - ref))))

    print("KERNEL_OK")
</pallas_src>

<mosaic_0001>
module attributes {stable_mosaic.version = 11 : i64} {
  func.func @_fuse_kernel(%arg0: i32, %arg1: memref<8x32xf32, #tpu.memory_space<vmem>>, %arg2: memref<8x32xf32, #tpu.memory_space<vmem>>, %arg3: memref<128x64xf32, #tpu.memory_space<vmem>>, %arg4: memref<1x64xf32, #tpu.memory_space<vmem>>, %arg5: memref<8x32xf32, #tpu.memory_space<vmem>>) attributes {dimension_semantics = [#tpu.dimension_semantics<parallel>], iteration_bounds = array<i64: 2>, scalar_prefetch = 0 : i64, scratch_operands = 0 : i64, tpu.core_type = #tpu.core_type<tc>, window_params = [{transform_indices = @transform_0, window_bounds = array<i64: 8, 32>}, {transform_indices = @transform_1, window_bounds = array<i64: 8, 32>}, {pipeline_mode = #tpu.pipeline_mode<synchronous>, transform_indices = @transform_2, window_bounds = array<i64: 128, 64>}, {pipeline_mode = #tpu.pipeline_mode<synchronous>, transform_indices = @transform_3, window_bounds = array<i64: 1, 64>}, {transform_indices = @transform_4, window_bounds = array<i64: 8, 32>}]} {
    %c0 = arith.constant 0 : index
    %c0_0 = arith.constant 0 : index
    %0 = vector.load %arg1[%c0, %c0_0] : memref<8x32xf32, #tpu.memory_space<vmem>>, vector<8x32xf32>
    %c0_1 = arith.constant 0 : index
    %c0_2 = arith.constant 0 : index
    %1 = vector.load %arg2[%c0_1, %c0_2] : memref<8x32xf32, #tpu.memory_space<vmem>>, vector<8x32xf32>
    %2 = arith.mulf %0, %1 : vector<8x32xf32>
    %3 = arith.subf %0, %1 : vector<8x32xf32>
    %4 = tpu.concatenate %0, %1, %2, %3 in 1 : vector<8x32xf32>, vector<8x32xf32>, vector<8x32xf32>, vector<8x32xf32> -> vector<8x128xf32>
    %c0_3 = arith.constant 0 : index
    %c0_4 = arith.constant 0 : index
    %5 = vector.load %arg3[%c0_3, %c0_4] : memref<128x64xf32, #tpu.memory_space<vmem>>, vector<128x64xf32>
    %cst = arith.constant dense<0.000000e+00> : vector<8x64xf32>
    %6 = tpu.matmul %4, %5, %cst {dimension_numbers = #tpu.dot_dimension_numbers<[1], [0], [0], [1], [0, 0, 1, 1], [], []>} : vector<8x128xf32>, vector<128x64xf32>, vector<8x64xf32> -> vector<8x64xf32>
    %c0_5 = arith.constant 0 : index
    %c0_6 = arith.constant 0 : index
    %7 = vector.load %arg4[%c0_5, %c0_6] : memref<1x64xf32, #tpu.memory_space<vmem>>, vector<1x64xf32>
    %8 = vector.broadcast %7 : vector<1x64xf32> to vector<8x64xf32>
    %9 = arith.addf %6, %8 : vector<8x64xf32>
    %10 = vector.extract_strided_slice %9 {offsets = [0, 0], sizes = [8, 32], strides = [1, 1]} : vector<8x64xf32> to vector<8x32xf32>
    %11 = math.tanh %10 : vector<8x32xf32>
    %12 = vector.extract_strided_slice %9 {offsets = [0, 32], sizes = [8, 1], strides = [1, 1]} : vector<8x64xf32> to vector<8x1xf32>
    %13 = arith.negf %12 : vector<8x1xf32>
    %14 = math.exp %13 : vector<8x1xf32>
    %cst_7 = arith.constant 1.000000e+00 : f32
    %15 = vector.broadcast %cst_7 : f32 to vector<8x1xf32>
    %16 = arith.addf %15, %14 : vector<8x1xf32>
    %17 = arith.divf %15, %16 : vector<8x1xf32>
    %18 = vector.broadcast %17 : vector<8x1xf32> to vector<8x32xf32>
    %19 = arith.mulf %18, %11 : vector<8x32xf32>
    %cst_8 = arith.constant 1.000000e+00 : f32
    %20 = vector.broadcast %cst_8 : f32 to vector<8x1xf32>
    %21 = arith.subf %20, %17 : vector<8x1xf32>
    %22 = vector.broadcast %21 : vector<8x1xf32> to vector<8x32xf32>
    %23 = arith.mulf %22, %0 : vector<8x32xf32>
    %24 = arith.addf %19, %23 : vector<8x32xf32>
    %c0_9 = arith.constant 0 : index
    %c0_10 = arith.constant 0 : index
    %25 = vector.load %arg5[%c0_9, %c0_10] : memref<8x32xf32, #tpu.memory_space<vmem>>, vector<8x32xf32>
    tpu.vector_store %arg5[%c0_9, %c0_10], %24 {strides = array<i32>} : memref<8x32xf32, #tpu.memory_space<vmem>>, vector<8x32xf32>,
    return
  }
  func.func @transform_0(%arg0: i32) -> (i32, i32) {
    %c0_i32 = arith.constant 0 : i32
    %c0_i32_0 = arith.constant 0 : i32
    return %arg0, %c0_i32 : i32, i32
  }
  func.func @transform_1(%arg0: i32) -> (i32, i32) {
    %c0_i32 = arith.constant 0 : i32
    %c0_i32_0 = arith.constant 0 : i32
    return %arg0, %c0_i32 : i32, i32
  }
  func.func @transform_2(%arg0: i32) -> (i32, i32) {
    %c0_i32 = arith.constant 0 : i32
    %c0_i32_0 = arith.constant 0 : i32
    %c0_i32_1 = arith.constant 0 : i32
    return %c0_i32, %c0_i32_0 : i32, i32
  }
  func.func @transform_3(%arg0: i32) -> (i32, i32) {
    %c0_i32 = arith.constant 0 : i32
    %c0_i32_0 = arith.constant 0 : i32
    %c0_i32_1 = arith.constant 0 : i32
    return %c0_i32, %c0_i32_0 : i32, i32
  }
  func.func @transform_4(%arg0: i32) -> (i32, i32) {
    %c0_i32 = arith.constant 0 : i32
    %c0_i32_0 = arith.constant 0 : i32
    return %arg0, %c0_i32 : i32, i32
  }
}

</mosaic_0001>

<bundles_post_ra>
// kernel: tpu_custom_call.1
= control target key start
LH: loop header
LB: loop body
LE: loop exit
PB: predicated region body
PF: predicated region fallthrough
CT: control target
= control target key end

     0   :  { %9 = vsyncpa [#allocation3], 0  ;;  %s834_s0 = inlined_call_operand.vmem [shape: f32[16,32], index: 0, kind: input, shape index: {}]   ;;  %s835_s1 = inlined_call_operand.vmem [shape: f32[16,32], index: 1, kind: input, shape index: {}]   ;;  %s836_s2 = inlined_call_operand.vmem [shape: f32[128,64], index: 2, kind: input, shape index: {}]   ;;  %s837_s3 = inlined_call_operand.vmem [shape: f32[1,64], index: 3, kind: input, shape index: {}]   ;;  %s838_s4 = inlined_call_operand.hbm [shape: f32[16,32], index: 4, kind: output, shape index: {}]  }
   0x1   :  { %11 = vsyncpa [#allocation3 + $0x1], 0  ;;  %s672_s15 = smov 0   ;;  %s674_s16 = smov 0  }
   0x2   :  { %s676_s17 = smov 0   ;;  %s678_s18 = smov 0  }
   0x3 LB: > { %s693_s19 = sadd.s32 4294967295, %s637_s18   ;;  %s432_s20 = sadd.s32 4294967294, %s637_s18   ;;  %s637_s18 = sphi %s678_s18, %s844_s18   ;;  %s633_s17 = sphi %s676_s17, %s843_s17   ;;  %s629_s16 = sphi %s674_s16, %s842_s16   ;;  %s625_s15 = sphi %s672_s15, %s841_s15  }
   0x4   : > { %s697_s21 = sadd.s32 1, %s637_s18   ;;  %s118_s22 = sadd.s32 1, %s633_s17 }
   0x5   : > { %s115_s23 = ssub.s32 %s637_s18, %s697_s21  ;;  %p128_p0 = scmp.ne.s32.totalorder %s633_s17, %s629_s16 }
   0x6   : > { %p116_p1 = scmp.eq.s32.totalorder %s115_s23, 0  ;;  %p129_p2 = scmp.eq.s32.totalorder %s693_s19, 1 }
   0x7   : > { %p134_p3 = scmp.ne.s32.totalorder %s629_s16, %s625_s15  ;;  %p135_p4 = scmp.eq.s32.totalorder %s432_s20, 1 }
   0x8   : > { %s708_s24 = scalar_select %p116_p1, %s633_s17, %s118_s22  }
   0x9   : > { %p710_p5 = por %p129_p2, %p128_p0  ;;  %p714_p6 = por %p135_p4, %p134_p3 }
   0xa   : > { %p435_p7 = scmp.ge.s32.totalorder %s637_s18, 1  ;;  %p173_p8 = scmp.lt.s32.totalorder %s637_s18, 3 }
   0xc   : > { %p174_p9 = pnand %p435_p7, %p173_p8 }
   0xd   : > { %p202_p10 = scmp.lt.s32.totalorder (!%p174_p9), %s693_s19, 1  ;;  %v232_v0 = vld [vmem:[%s836_s2] sm:$0xff] (!%p174_p9)  ;;  %v233_v1 = vld [vmem:[%s836_s2 + $0x8] sm:$0xff] (!%p174_p9)  ;;  %v234_v2 = vld [vmem:[%s836_s2 + $0x10] sm:$0xff] (!%p174_p9)  ;;  %v639_v3 = vmov (!%p174_p9), 0.0|0.0   ;;  %vm640_vm0 = vmmov (!%p174_p9), 0  }
   0xe   : > { %177 = sbr.rel (%p174_p9) target bundleno = 535 (0x217), region = 36  ;;  %497 = vmatprep.subr.bf16.mxu0 (!%p174_p9), %v639_v3  ;;  %v498_v4 = vpack.c.bf16 (!%p174_p9), %v233_v1, %v232_v0  ;;  %v235_v5 = vld [vmem:[%s836_s2 + $0x18] sm:$0xff] (!%p174_p9)  ;;  %v236_v7 = vld [vmem:[%s836_s2 + $0x20] sm:$0xff] (!%p174_p9)  ;;  %v237_v8 = vld [vmem:[%s836_s2 + $0x28] sm:$0xff] (!%p174_p9)  ;;  %v641_v9 = vmov (!%p174_p9), 0.0   ;;  %s642_s30 = smov (!%p174_p9), 32  }
   0xf   : > { %v501_v6 = vpack.c.bf16 (!%p174_p9), %v235_v5, %v234_v2  ;;  %494 = vmatprep.mubr.msk.f32.mxu0 (!%p174_p9), %vm640_vm0, %v641_v9  ;;  %v504_v14 = vpack.c.bf16 (!%p174_p9), %v237_v8, %v236_v7  ;;  %v238_v15 = vld [vmem:[%s836_s2 + $0x30] sm:$0xff] (!%p174_p9)  ;;  %v239_v16 = vld [vmem:[%s836_s2 + $0x38] sm:$0xff] (!%p174_p9)  ;;  %v240_v18 = vld [vmem:[%s836_s2 + $0x40] sm:$0xff] (!%p174_p9)  ;;  %vm226_vm1 = vcmask (!%p174_p9), 261120   ;;  %vm228_vm2 = vcmask (!%p174_p9), 523264   ;;  %s199_s12 = sand.u32 (!%p174_p9), 1, %s629_s16  }
  0x10   : > { %499 = vmatpush3.bf16.msra.mxu0 (!%p174_p9), %v498_v4  ;;  %v507_v17 = vpack.c.bf16 (!%p174_p9), %v239_v16, %v238_v15  ;;  %v241_v19 = vld [vmem:[%s836_s2 + $0x48] sm:$0xff] (!%p174_p9)  ;;  %v242_v21 = vld [vmem:[%s836_s2 + $0x50] sm:$0xff] (!%p174_p9)  ;;  %v243_v22 = vld [vmem:[%s836_s2 + $0x58] sm:$0xff] (!%p174_p9)  ;;  %vm230_vm3 = vcmask (!%p174_p9), 785408   ;;  %v645_v36 = vmov (!%p174_p9), 32   ;;  %s436_s13 = sshll.u32 (!%p174_p9), %s199_s12, 3 }
  0x11   : > { %500 = vmatprep.subr.bf16.mxu0 (!%p174_p9), %v639_v3  ;;  %v510_v20 = vpack.c.bf16 (!%p174_p9), %v241_v19, %v240_v18  ;;  %v513_v23 = vpack.c.bf16 (!%p174_p9), %v243_v22, %v242_v21  ;;  %v244_v24 = vld [vmem:[%s836_s2 + $0x60] sm:$0xff] (!%p174_p9)  ;;  %v245_v25 = vld [vmem:[%s836_s2 + $0x68] sm:$0xff] (!%p174_p9)  ;;  %v246_v27 = vld [vmem:[%s836_s2 + $0x70] sm:$0xff] (!%p174_p9)  ;;  %567 = vset.pattern.permute.xlu1 (!%p174_p9), %v645_v36  ;;  %s442_s14 = sshll.u32 (!%p174_p9), %s693_s19, 7  ;;  %s201_s20 = scalar_lea.vmem (!%p174_p9), [#allocation2], %s436_s13 }
  0x12   : > { %v516_v26 = vpack.c.bf16 (!%p174_p9), %v245_v25, %v244_v24  ;;  %v247_v28 = vld [vmem:[%s836_s2 + $0x78] sm:$0xff] (!%p174_p9)  ;;  %568 = vset.pattern.permute.xlu0 (!%p174_p9), %v645_v36  ;;  %v439_v37 = vld [vmem:[%s837_s3] ss:$0 sm:$0xff] (!%p174_p9)  ;;  %s361_s22 = sshll.u32 (!%p174_p9), %s201_s20, 4  ;;  %s791_s28 = scalar_lea.hbm (!%p174_p9), %s838_s4, %s442_s14  ;;  %s793_s22 = int_to_ptr.vmem [resolvable:$true] %s361_s22 }
  0x13   : > { %v519_v29 = vpack.c.bf16 (!%p174_p9), %v247_v28, %v246_v27 }
  0x14   : > { %502 = vmatpush3.bf16.msra.mxu0 (!%p174_p9), %v501_v6 }
  0x15   : > { %s203_s9 = scalar_select %p202_p10, %s693_s19, 1  ;;  %503 = vmatprep.subr.bf16.mxu0 %v639_v3 }
  0x16   : > { %s575_s19 = scalar_lea.vmem %s793_s22, 128 }
  0x17   : > { %s437_s10 = sshll.u32 %s203_s9, 3  ;;  %s643_s9 = smov 96  }
  0x18   : > { %s209_s23 = scalar_lea.vmem %s835_s1, %s437_s10  ;;  %s205_s29 = scalar_lea.vmem %s834_s0, %s437_s10  ;;  %505 = vmatpush3.bf16.msra.mxu0 %v504_v14 }
  0x19   : > { %v211_v10 = vld [vmem:[%s209_s23] sm:$0xff]  ;;  %s644_s10 = smov 64   ;;  %506 = vmatprep.subr.bf16.mxu0 %v639_v3  ;;  %p576_p11 = scmp.ne.s32.totalorder %s793_s22, %s575_s19 }
  0x1a   : > { %v746_v11 = vld [vmem:[%s205_s29] sm:$0xff]  ;;  %215 = vrot.lane.b32.xlu0 %v211_v10, %s642_s30  ;;  %s348_s29 = scalar_lea.sflag [#allocation3], %s199_s12  ;;  %s646_s30 = smov [#allocation2]  }
  0x1b   : > { %v212_v12 = vmul.f32 %v211_v10, %v746_v11  ;;  %v213_v13 = vsub.f32 %v746_v11, %v211_v10  ;;  %p577_p12 = pnand %p576_p11, %p710_p5  ;;  %s579_s5 = sshll.u32 %s646_s30, 4  ;;  %s580_s5 = int_to_ptr.vmem [resolvable:$false] %s579_s5 }
  0x1c   : > { %508 = vmatpush3.bf16.msra.mxu0 %v507_v17  ;;  %s581_s6 = scalar_lea.vmem %s580_s5, 256  ;;  %p582_p0 = scmp.lt.s32.totalorder %s793_s22, %s580_s5 }
  0x1d   : > { %223 = vrot.lane.b32.xlu1 %v213_v13, %s643_s9  ;;  %509 = vmatprep.subr.bf16.mxu0 %v639_v3  ;;  %p578_p13 = pneg %p577_p12  ;;  %p583_p1 = scmp.lt.s32.totalorder %s581_s6, %s575_s19 }
  0x1e   : > { %219 = vrot.lane.b32.xlu0 %v212_v12, %s644_s10 }
  0x1f   : > { %p584_p2 = por %p583_p1, %p582_p0 }
  0x20   : > { %511 = vmatpush3.bf16.msra.mxu0 %v510_v20 }
  0x21   : > { %512 = vmatprep.subr.bf16.mxu0 %v639_v3  ;;  %p585_p3 = pnand %p584_p2, %p578_p13 }
  0x24   : > { %514 = vmatpush3.bf16.msra.mxu0 %v513_v23 }
  0x25   : > { %515 = vmatprep.subr.bf16.mxu0 %v639_v3 }
  0x28   : > { %517 = vmatpush3.bf16.msra.mxu0 %v516_v26 }
  0x29   : > { %518 = vmatprep.subr.bf16.mxu0 %v639_v3 }
  0x2c   : > { %520 = vmatpush3.bf16.msra.mxu0 %v519_v29 }
  0x8c   : > { %v216_v30 = vpop.permute.xlu0 %215 }
  0x8d   : > { %v227_v32 = vsel %vm226_vm1, %v746_v11, %v216_v30 }
  0x8f   : > { %v224_v31 = vpop.permute.xlu1 %223 }
  0x90   : > { %v220_v33 = vpop.permute.xlu0 %219 }
  0x91   : > { %v229_v34 = vsel %vm228_vm2, %v227_v32, %v220_v33 }
  0x92   : > { %v231_v35 = vsel %vm230_vm3, %v229_v34, %v224_v31 }
  0x93   : > { %495 = vmatmul.mubr.f32.vlgmr.msra.gmra.mrb[0].mxu0 %v231_v35 }
 0x166   : > { %v321_v38 = vpop.f32.mrb[0].mxu0 }
 0x167   : > { %v322_v39 = vadd.f32 %v439_v37, %v321_v38  ;;  %v496_v40 = vpop.f32.mrb[1].mxu0 }
 0x169   : > { %v440_v41 = vmul.f32 -1.442695, %v322_v39 }
 0x16b   : > { %569 = vpow2.f32 %v440_v41 }
 0x175   : > { %v570_v42 = vpop.eup %569 }
 0x176   : > { %v329_v43 = vadd.f32 1.0, %v570_v42 }
 0x178   : > { %571 = vrcp.f32 %v329_v43 }
 0x179   : > { %573 = vtanh.f32 %v322_v39 }
 0x182   : > { %v572_v44 = vpop.eup %571 }
 0x183   : > { %334 = vperm.xlu1 %567, %v572_v44   ;;  %v338_v45 = vsub.f32 1.0, %v572_v44  ;;  %v574_v47 = vpop.eup %573 }
 0x185   : > { %341 = vperm.xlu0 %568, %v338_v45  }
 0x202   : > { %v335_v46 = vpop.permute.xlu1 %334 }
 0x203   : > { %v337_v49 = vmul.f32 %v574_v47, %v335_v46 }
 0x204   : > { %v342_v48 = vpop.permute.xlu0 %341 }
 0x205   : > { %v344_v50 = vmul.f32 %v342_v48, %v746_v11 }
 0x207   : > { %v345_v51 = vadd.f32 %v344_v50, %v337_v49 }
 0x209   : > { %346 = vst.msk [vmem:[%s201_s20] sm:$0xff] %vm226_vm1, %v345_v51 }
 0x20a   : > { %588 = shalt.err (!%p585_p3)
}
 0x20b   : > { %s589_s7 = scalar_lea.hbm %s791_s28, 128  ;;  %s593_s10 = scalar_lea.hbm %s838_s4, 256 }
 0x20c   : > { %p590_p4 = scmp.ne.s32.totalorder %s791_s28, %s589_s7  ;;  %p594_p9 = scmp.lt.u32.totalorder %s791_s28, %s838_s4 }
 0x20d   : > { %p595_p10 = scmp.lt.u32.totalorder %s593_s10, %s589_s7  ;;  %p597_p12 = scmp.lt.u32.totalorder %s589_s7, %s791_s28 }
 0x20e   : > { %p591_p7 = pnand %p590_p4, %p710_p5 }
 0x20f   : > { %p596_p11 = por %p595_p10, %p594_p9 }
 0x210   : > { %p592_p8 = pneg %p591_p7 }
 0x211   : > { %p598_p13 = por %p597_p12, %p596_p11 }
 0x213   : > { %p599_p0 = pnand %p598_p13, %p592_p8 }
 0x215   : > { %602 = shalt.err (!%p599_p0)
}
 0x216   : > { %521 = dma.vmem_to_hbm [thread:$0]  (%p710_p5), %s793_s22, 128, %s791_s28, %s348_s29  }
 0x217 PF: > { %p527_p1 = scmp.ge.s32.totalorder %s637_s18, 2  ;;  %s373_s13 = sand.u32 1, %s625_s15  }
 0x218   : > { %s374_s14 = scalar_lea.sflag [#allocation3], %s373_s13 }
 0x219   : > { %p524_p2 = pnand %p527_p1, %p714_p6 }
 0x21b   : > { %620 = dma.done.wait (!%p524_p2), %s374_s14, 128  }
 0x21c   : > { %622 = vsyncadd (!%p524_p2), %s374_s14, 4294967168  ;;  %p14_p3 = scmp.ge.s32.totalorder %s697_s21, 4   ;;  %s841_s15 = smov %s629_s16 }
 0x21d   : > { %s842_s16 = smov %s633_s17  ;;  %s843_s17 = smov %s708_s24 }
 0x21e   : > { %s844_s18 = smov %s697_s21  ;;  %16 = sbr.rel (!%p14_p3) target bundleno = 3 (0x3), region = 74 }
 0x225   :  { %379 = vsyncpa [#allocation3], 1 }
 0x226   :  { %381 = vsyncpa [#allocation3 + $0x1], 1 }

</bundles_post_ra>
